<compile_context>
chip_gen: v7x
topology: tpu7x:2x2x1
jax: 0.10.0
libtpu: 0.0.40
codegen_flags: <defaults>
</compile_context>

<pallas_src>
import math

import jax
import jax.numpy as jnp
from jax.experimental import pallas as pl
from jax.experimental.pallas import tpu as pltpu

KH, KW = 3, 7          # kernel_size=(3, 7)
SH, SW = 1, 2          # stride=(1, 2)
PH, PW = 1, 3          # padding=(1, 3)
BN_EPS = 1e-5
GELU_EPS = 1e-8
INV_SQRT2 = 1.0 / math.sqrt(2.0)
LANES = 128
VMEM_LIMIT = 32 * 1024 * 1024   # v7x has 64 MiB VMEM/TC; leave headroom for XLA


def _erf_nonneg(x):
    """erf(x) for x >= 0 (Abramowitz & Stegun 7.1.26, |err| < 1.5e-7).

    |z| is always >= 0 here, so no sign handling is needed; only exp/mul/div
    are used, which lower cleanly on every TPU generation.
    """
    t = 1.0 / (1.0 + 0.3275911 * x)
    poly = t * (0.254829592 + t * (-0.284496736 + t * (1.421413741
             + t * (-1.453152027 + t * 1.061405429))))
    return 1.0 - poly * jnp.exp(-x * x)


def _conv_stats_kernel(p_ref, w_ref, conv_ref, sum_ref, ssq_ref):
    """Fused complex-conv contraction + single-pass BN partial statistics.

    p_ref    : (TM, 2K) bf16 im2col patches  [real taps | imag taps]
    w_ref    : (2K, CP) bf16 block weight    [[Wr, Wi], [-Wi, Wr]] (lane padded)
    conv_ref : (TM, CP) bf16 conv output     (real lanes | imag lanes)
    sum_ref  : (8, CP)  f32  per-sublane-group channel sums
    ssq_ref  : (8, CP)  f32  per-sublane-group channel sums of squares
    """
    c = jnp.dot(p_ref[...], w_ref[...], preferred_element_type=jnp.float32)
    conv_ref[...] = c.astype(conv_ref.dtype)
    g = c.shape[0] // 8
    cg = c.reshape(g, 8, c.shape[1])            # sublane-tile groups (free reshape)
    sum_ref[...] = jnp.sum(cg, axis=0)          # VPU adds only, no XLU reduce
    ssq_ref[...] = jnp.sum(cg * cg, axis=0)


def _bn_gelu_kernel(c_ref, scale_ref, shift_ref, o_ref):
    """BN affine (scale/shift pre-folded from batch stats) + ComplexGELU.

    Real channels occupy lanes [0, CP/2), imag channels [CP/2, CP).  |z| and
    the GELU gate are computed once on the half width, then re-assembled with
    one lane concat so the store is a full-width unmasked vst.
    """
    ch = o_ref.shape[-1] // 2
    y = c_ref[...].astype(jnp.float32) * scale_ref[...] + shift_ref[...]
    yr, yi = y[:, :ch], y[:, ch:]
    mag = jnp.sqrt(yr * yr + yi * yi)
    act = 0.5 * mag * (1.0 + _erf_nonneg(mag * INV_SQRT2))    # exact GELU(|z|)
    s = act / (mag + GELU_EPS)
    o_ref[...] = jnp.concatenate([yr * s, yi * s], axis=-1).astype(o_ref.dtype)


def encoder_block_pallas(x_complex, params, *, tm=512):
    """x_complex: complex64 (N, Cin, H, W) NCHW.  Returns complex64 NCHW."""
    xr = jnp.real(x_complex).astype(jnp.float32)
    xi = jnp.imag(x_complex).astype(jnp.float32)
    N, Cin, H, W = xr.shape
    Hout = (H + 2 * PH - KH) // SH + 1
    Wout = (W + 2 * PW - KW) // SW + 1
    Cout = params["wr"].shape[0]

    K = KH * KW * Cin                               # taps*Cin per real/imag plane
    K2 = 2 * K                                      # true contraction depth
    CH = (LANES // 2) * pl.cdiv(2 * Cout, LANES)    # real-lane half width
    CP = 2 * CH                                     # lane-dense channel axis
    M = N * Hout * Wout

    # Biggest tile that still leaves >= 2 grid steps (v7x: 2 TensorCores).
    tm = max(16, min(tm, pl.cdiv(pl.cdiv(M, 2), 8) * 8))
    MP = pl.cdiv(M, tm) * tm
    NT = MP // tm

    # ---- wrapper-side im2col (bf16): NCHW -> lane-dense (MP, 2K) patches ----
    # TODO(synk): at production U-Net sizes move patch construction into the
    # kernel (padded NHWC slab in HBM + per-kh row bands with strided pl.ds
    # taps) to kill the ~KH*KW/SW x HBM inflation of im2col, and pack output
    # pixels into the lane axis when 2*Cout < 128 to fill the 256-wide MXU.
    def im2col(plane):
        p = jnp.transpose(plane, (0, 2, 3, 1))                    # NCHW -> NHWC
        p = jnp.pad(p, ((0, 0), (PH, PH), (PW, PW), (0, 0)))
        taps = [p[:, kh:kh + SH * Hout:SH, kw:kw + SW * Wout:SW, :]
                for kh in range(KH) for kw in range(KW)]
        return jnp.concatenate(taps, axis=-1).reshape(M, K)

    patches = jnp.concatenate([im2col(xr), im2col(xi)], axis=1)   # (M, 2K)
    patches = jnp.pad(patches, ((0, MP - M), (0, 0))).astype(jnp.bfloat16)

    # ---- block weight [[Wr, Wi], [-Wi, Wr]] (bf16), lane-padded columns -----
    def flat_w(w):   # (Cout, Cin, KH, KW) -> (K, Cout), tap-major like patches
        return jnp.transpose(w, (2, 3, 1, 0)).reshape(K, Cout).astype(jnp.float32)

    wr, wi = flat_w(params["wr"]), flat_w(params["wi"])
    wblk = jnp.zeros((K2, CP), jnp.float32)
    wblk = wblk.at[:K, :Cout].set(wr).at[K:, :Cout].set(-wi)
    wblk = wblk.at[:K, CH:CH + Cout].set(wi).at[K:, CH:CH + Cout].set(wr)
    wblk = wblk.astype(jnp.bfloat16)

    def pad_vec(vr, vi):
        v = jnp.zeros((CP,), jnp.float32)
        return (v.at[:Cout].set(vr.astype(jnp.float32))
                 .at[CH:CH + Cout].set(vi.astype(jnp.float32)))

    gamma = pad_vec(params["gamma_r"], params["gamma_i"])
    beta = pad_vec(params["beta_r"], params["beta_i"])

    cparams = pltpu.CompilerParams(dimension_semantics=("parallel",),
                                   vmem_limit_bytes=VMEM_LIMIT)

    # ---- pass 1: fused conv contraction + per-tile BN partial sums ----------
    # TODO(synk): if the patch DMA is still exposed at deep-layer Cin, add
    # pipeline_mode=pl.Buffered(3) on the patch BlockSpec.
    conv, psum, pssq = pl.pallas_call(
        _conv_stats_kernel,
        grid=(NT,),
        in_specs=[pl.BlockSpec((tm, K2), lambda i: (i, 0)),
                  pl.BlockSpec((K2, CP), lambda i: (0, 0))],
        out_specs=(pl.BlockSpec((tm, CP), lambda i: (i, 0)),
                   pl.BlockSpec((8, CP), lambda i: (i, 0)),
                   pl.BlockSpec((8, CP), lambda i: (i, 0))),
        out_shape=(jax.ShapeDtypeStruct((MP, CP), jnp.bfloat16),
                   jax.ShapeDtypeStruct((NT * 8, CP), jnp.float32),
                   jax.ShapeDtypeStruct((NT * 8, CP), jnp.float32)),
        compiler_params=cparams,
    )(patches, wblk)

    # ---- tiny per-channel fold: batch mean/var -> BN scale/shift (f32) ------
    # Single-pass var = E[x^2] - E[x]^2 (biased, training-mode BN).
    # TODO(synk): switch to a centered two-pass if conv bias terms make the
    # channel means large relative to their std (cancellation risk).
    inv_m = jnp.float32(1.0 / M)              # zero-padded rows contribute 0
    ch_sum = jnp.sum(psum.reshape(NT, 8, CP), axis=(0, 1))
    ch_ssq = jnp.sum(pssq.reshape(NT, 8, CP), axis=(0, 1))
    mean = ch_sum * inv_m
    var = jnp.maximum(ch_ssq * inv_m - mean * mean, 0.0)
    scale = gamma * jax.lax.rsqrt(var + BN_EPS)
    shift = beta - mean * scale

    # ---- pass 2: BN affine + complex GELU ------------------------------------
    y = pl.pallas_call(
        _bn_gelu_kernel,
        grid=(NT,),
        in_specs=[pl.BlockSpec((tm, CP), lambda i: (i, 0)),
                  pl.BlockSpec((1, CP), lambda i: (0, 0)),
                  pl.BlockSpec((1, CP), lambda i: (0, 0))],
        out_specs=pl.BlockSpec((tm, CP), lambda i: (i, 0)),
        out_shape=jax.ShapeDtypeStruct((MP, CP), jnp.float32),
        compiler_params=cparams,
    )(conv, scale.reshape(1, CP), shift.reshape(1, CP))

    # ---- back to NCHW complex (module interface) -----------------------------
    # TODO(synk): when chained inside the U-Net, keep the lane-dense NHWC slab
    # end-to-end and drop this transpose pair + the im2col transpose above.
    y = y[:M].reshape(N, Hout, Wout, CP)
    yr = jnp.transpose(y[..., :Cout], (0, 3, 1, 2))
    yi = jnp.transpose(y[..., CH:CH + Cout], (0, 3, 1, 2))
    return jax.lax.complex(yr, yi)


def encoder_block_ref(x_complex, params):
    """Pure-JAX reference replicating the PyTorch forward (training-mode BN)."""
    xr = jnp.real(x_complex).astype(jnp.float32)
    xi = jnp.imag(x_complex).astype(jnp.float32)

    def conv(x, w):
        return jax.lax.conv_general_dilated(
            x, w, window_strides=(SH, SW), padding=((PH, PH), (PW, PW)),
            dimension_numbers=("NCHW", "OIHW", "NCHW"))

    rr = conv(xr, params["wr"]) - conv(xi, params["wi"])
    ii = conv(xi, params["wr"]) + conv(xr, params["wi"])

    def bn(y, g, b):
        mean = y.mean(axis=(0, 2, 3), keepdims=True)
        var = ((y - mean) ** 2).mean(axis=(0, 2, 3), keepdims=True)
        y = (y - mean) / jnp.sqrt(var + BN_EPS)
        return y * g.reshape(1, -1, 1, 1) + b.reshape(1, -1, 1, 1)

    yr = bn(rr, params["gamma_r"], params["beta_r"])
    yi = bn(ii, params["gamma_i"], params["beta_i"])
    mag = jnp.sqrt(yr * yr + yi * yi)
    act = 0.5 * mag * (1.0 + jax.lax.erf(mag / jnp.sqrt(2.0)))
    s = act / (mag + GELU_EPS)
    return jax.lax.complex(yr * s, yi * s)


def make_params(key, in_c, out_c):
    k = jax.random.split(key, 6)
    fan_in = in_c * KH * KW
    bound = 1.0 / math.sqrt(fan_in)
    return {
        "wr": jax.random.uniform(k[0], (out_c, in_c, KH, KW), jnp.float32,
                                 -bound, bound),
        "wi": jax.random.uniform(k[1], (out_c, in_c, KH, KW), jnp.float32,
                                 -bound, bound),
        "gamma_r": 1.0 + 0.1 * jax.random.normal(k[2], (out_c,), jnp.float32),
        "beta_r": 0.1 * jax.random.normal(k[3], (out_c,), jnp.float32),
        "gamma_i": 1.0 + 0.1 * jax.random.normal(k[4], (out_c,), jnp.float32),
        "beta_i": 0.1 * jax.random.normal(k[5], (out_c,), jnp.float32),
    }


if __name__ == "__main__":
    key = jax.random.PRNGKey(0)
    kx, kp = jax.random.split(key)
    N, IN_C, OUT_C, H, W = 2, 4, 8, 16, 16

    kr, ki = jax.random.split(kx)
    x = jax.lax.complex(jax.random.normal(kr, (N, IN_C, H, W), jnp.float32),
                        jax.random.normal(ki, (N, IN_C, H, W), jnp.float32))
    params = make_params(kp, IN_C, OUT_C)

    y = encoder_block_pallas(x, params)       # M = 2*16*8 = 256 -> tm=128, NT=2
    y = jax.block_until_ready(y)

    y_ref = encoder_block_ref(x, params)
    Wout = (W + 2 * PW - KW) // SW + 1
    assert y.shape == (N, OUT_C, H, Wout)
    # bf16 MXU inputs + bf16 conv intermediate (f32 accumulation / statistics)
    # leave ~1% relative noise on the BN-normalized outputs; tolerance widened
    # accordingly.
    assert jnp.allclose(jnp.real(y), jnp.real(y_ref), atol=5e-2, rtol=5e-2)
    assert jnp.allclose(jnp.imag(y), jnp.imag(y_ref), atol=5e-2, rtol=5e-2)

    print("KERNEL_OK")
</pallas_src>

<mosaic_0001>
module attributes {stable_mosaic.version = 11 : i64} {
  func.func @_conv_stats_kernel(%arg0: i32, %arg1: memref<128x168xbf16, #tpu.memory_space<vmem>>, %arg2: memref<168x128xbf16, #tpu.memory_space<vmem>>, %arg3: memref<128x128xbf16, #tpu.memory_space<vmem>>, %arg4: memref<8x128xf32, #tpu.memory_space<vmem>>, %arg5: memref<8x128xf32, #tpu.memory_space<vmem>>) attributes {dimension_semantics = [#tpu.dimension_semantics<parallel>], iteration_bounds = array<i64: 2>, scalar_prefetch = 0 : i64, scratch_operands = 0 : i64, tpu.core_type = #tpu.core_type<tc>, window_params = [{transform_indices = @transform_0, window_bounds = array<i64: 128, 168>}, {pipeline_mode = #tpu.pipeline_mode<synchronous>, transform_indices = @transform_1, window_bounds = array<i64: 168, 128>}, {transform_indices = @transform_2, window_bounds = array<i64: 128, 128>}, {transform_indices = @transform_3, window_bounds = array<i64: 8, 128>}, {transform_indices = @transform_4, window_bounds = array<i64: 8, 128>}]} {
    %c0 = arith.constant 0 : index
    %c0_0 = arith.constant 0 : index
    %0 = vector.load %arg1[%c0, %c0_0] : memref<128x168xbf16, #tpu.memory_space<vmem>>, vector<128x168xbf16>
    %c0_1 = arith.constant 0 : index
    %c0_2 = arith.constant 0 : index
    %1 = vector.load %arg2[%c0_1, %c0_2] : memref<168x128xbf16, #tpu.memory_space<vmem>>, vector<168x128xbf16>
    %cst = arith.constant dense<0.000000e+00> : vector<128x128xf32>
    %2 = tpu.matmul %0, %1, %cst {dimension_numbers = #tpu.dot_dimension_numbers<[1], [0], [0], [1], [0, 0, 1, 1], [], []>} : vector<128x168xbf16>, vector<168x128xbf16>, vector<128x128xf32> -> vector<128x128xf32>
    %3 = arith.truncf %2 : vector<128x128xf32> to vector<128x128xbf16>
    %c0_3 = arith.constant 0 : index
    %c0_4 = arith.constant 0 : index
    %4 = vector.load %arg3[%c0_3, %c0_4] : memref<128x128xbf16, #tpu.memory_space<vmem>>, vector<128x128xbf16>
    tpu.vector_store %arg3[%c0_3, %c0_4], %3 {strides = array<i32>} : memref<128x128xbf16, #tpu.memory_space<vmem>>, vector<128x128xbf16>,
    %5 = vector.shape_cast %2 : vector<128x128xf32> to vector<16x8x128xf32>
    %cst_5 = arith.constant dense<0.000000e+00> : vector<8x128xf32>
    %6 = vector.multi_reduction <add>, %5, %cst_5 [0] : vector<16x8x128xf32> to vector<8x128xf32>
    %c0_6 = arith.constant 0 : index
    %c0_7 = arith.constant 0 : index
    %7 = vector.load %arg4[%c0_6, %c0_7] : memref<8x128xf32, #tpu.memory_space<vmem>>, vector<8x128xf32>
    tpu.vector_store %arg4[%c0_6, %c0_7], %6 {strides = array<i32>} : memref<8x128xf32, #tpu.memory_space<vmem>>, vector<8x128xf32>,
    %8 = arith.mulf %5, %5 : vector<16x8x128xf32>
    %cst_8 = arith.constant dense<0.000000e+00> : vector<8x128xf32>
    %9 = vector.multi_reduction <add>, %8, %cst_8 [0] : vector<16x8x128xf32> to vector<8x128xf32>
    %c0_9 = arith.constant 0 : index
    %c0_10 = arith.constant 0 : index
    %10 = vector.load %arg5[%c0_9, %c0_10] : memref<8x128xf32, #tpu.memory_space<vmem>>, vector<8x128xf32>
    tpu.vector_store %arg5[%c0_9, %c0_10], %9 {strides = array<i32>} : memref<8x128xf32, #tpu.memory_space<vmem>>, vector<8x128xf32>,
    return
  }
  func.func @transform_0(%arg0: i32) -> (i32, i32) {
    %c0_i32 = arith.constant 0 : i32
    %c0_i32_0 = arith.constant 0 : i32
    return %arg0, %c0_i32 : i32, i32
  }
  func.func @transform_1(%arg0: i32) -> (i32, i32) {
    %c0_i32 = arith.constant 0 : i32
    %c0_i32_0 = arith.constant 0 : i32
    %c0_i32_1 = arith.constant 0 : i32
    return %c0_i32, %c0_i32_0 : i32, i32
  }
  func.func @transform_2(%arg0: i32) -> (i32, i32) {
    %c0_i32 = arith.constant 0 : i32
    %c0_i32_0 = arith.constant 0 : i32
    return %arg0, %c0_i32 : i32, i32
  }
  func.func @transform_3(%arg0: i32) -> (i32, i32) {
    %c0_i32 = arith.constant 0 : i32
    %c0_i32_0 = arith.constant 0 : i32
    return %arg0, %c0_i32 : i32, i32
  }
  func.func @transform_4(%arg0: i32) -> (i32, i32) {
    %c0_i32 = arith.constant 0 : i32
    %c0_i32_0 = arith.constant 0 : i32
    return %arg0, %c0_i32 : i32, i32
  }
}

</mosaic_0001>

<bundles_post_ra>
// kernel: tpu_custom_call.1
= control target key start
LH: loop header
LB: loop body
LE: loop exit
PB: predicated region body
PF: predicated region fallthrough
CT: control target
= control target key end

     0   :  { %10 = vsyncpa [#allocation3], 0  ;;  %s1535_s0 = inlined_call_operand.vmem [shape: bf16[256,168], index: 0, kind: input, shape index: {}]   ;;  %s1536_s1 = inlined_call_operand.vmem [shape: bf16[168,128], index: 1, kind: input, shape index: {}]   ;;  %s1537_s2 = inlined_call_operand.hbm [shape: bf16[256,128], index: 2, kind: output, shape index: {0}]   ;;  %s1538_s3 = inlined_call_operand.hbm [shape: f32[16,128], index: 3, kind: output, shape index: {1}]   ;;  %s1539_s4 = inlined_call_operand.hbm [shape: f32[16,128], index: 4, kind: output, shape index: {2}]  }
   0x1   :  { %12 = vsyncpa [#allocation3 + $0x1], 0 }
   0x2   :  { %13 = vsyncpa [#allocation5], 0 }
   0x3   :  { %15 = vsyncpa [#allocation5 + $0x1], 0  ;;  %s1219_s15 = smov 0   ;;  %s1221_s16 = smov 0  }
   0x4   :  { %s1223_s17 = smov 0   ;;  %s1225_s18 = smov 0  }
   0x5 LB: > { %s1240_s19 = sadd.s32 4294967295, %s1186_s18   ;;  %s820_s20 = sadd.s32 4294967294, %s1186_s18   ;;  %s1186_s18 = sphi %s1225_s18, %s1545_s18   ;;  %s1182_s17 = sphi %s1223_s17, %s1544_s17   ;;  %s1178_s16 = sphi %s1221_s16, %s1543_s16   ;;  %s1174_s15 = sphi %s1219_s15, %s1542_s15  }
   0x6   : > { %s1244_s21 = sadd.s32 1, %s1186_s18   ;;  %s75_s22 = sadd.s32 1, %s1182_s17 }
   0x7   : > { %s72_s23 = ssub.s32 %s1186_s18, %s1244_s21  ;;  %p85_p0 = scmp.ne.s32.totalorder %s1182_s17, %s1178_s16 }
   0x8   : > { %p73_p1 = scmp.eq.s32.totalorder %s72_s23, 0  ;;  %p86_p2 = scmp.eq.s32.totalorder %s1240_s19, 1 }
   0x9   : > { %p91_p3 = scmp.ne.s32.totalorder %s1178_s16, %s1174_s15  ;;  %p92_p4 = scmp.eq.s32.totalorder %s820_s20, 1 }
   0xa   : > { %s1257_s24 = scalar_select %p73_p1, %s1182_s17, %s75_s22  }
   0xb   : > { %p1259_p5 = por %p86_p2, %p85_p0  ;;  %p1263_p6 = por %p92_p4, %p91_p3 }
   0xc   : > { %p823_p7 = scmp.ge.s32.totalorder %s1186_s18, 1  ;;  %p175_p8 = scmp.lt.s32.totalorder %s1186_s18, 3 }
   0xe   : > { %p176_p9 = pnand %p823_p7, %p175_p8 }
   0xf   : > { %v1029_v0 = vld [vmem:[%s1536_s1] sm:$0xff] (!%p176_p9)   ;;  %v1188_v1 = vmov (!%p176_p9), 0   ;;  %v1030_v2 = vld [vmem:[%s1536_s1 + $0x8] sm:$0xff] (!%p176_p9)   ;;  %s827_s5 = sshll.u32 (!%p176_p9), %s1240_s19, 4  ;;  %v1031_v3 = vld [vmem:[%s1536_s1 + $0x10] sm:$0xff] (!%p176_p9)   ;;  %vm393_vm0 = vcmask (!%p176_p9), 326656  }
  0x10   : > { %179 = sbr.rel (%p176_p9) target bundleno = 366 (0x16e), region = 28  ;;  %422 = vmatprep.subr.bf16.mxu0 (!%p176_p9), %v1188_v1  ;;  %955 = vmatprep.subr.bf16.mxu1 (!%p176_p9), %v1188_v1  ;;  %p213_p10 = scmp.lt.s32.totalorder (!%p176_p9), %s827_s5, 31  ;;  %v1032_v4 = vld [vmem:[%s1536_s1 + $0x18] sm:$0xff] (!%p176_p9)   ;;  %v1033_v6 = vld [vmem:[%s1536_s1 + $0x20] sm:$0xff] (!%p176_p9)   ;;  %v1034_v8 = vld [vmem:[%s1536_s1 + $0x28] sm:$0xff] (!%p176_p9)   ;;  %vm418_vm1 = vcmask (!%p176_p9), 1043456  }
  0x11   : > { %423 = vmatpush1.bf16.msra.mxu0 (!%p176_p9), %v1029_v0  ;;  %966 = vmatpush1.bf16.msra.mxu1 (!%p176_p9), %v1029_v0  ;;  %v1035_v9 = vld [vmem:[%s1536_s1 + $0x30] sm:$0xff] (!%p176_p9)   ;;  %v1036_v10 = vld [vmem:[%s1536_s1 + $0x38] sm:$0xff] (!%p176_p9)   ;;  %v1037_v11 = vld [vmem:[%s1536_s1 + $0x40] sm:$0xff] (!%p176_p9)   ;;  %s1355_s13 = sand.u32 (!%p176_p9), 1, %s1178_s16   ;;  %s907_s22 = sshll.u32 (!%p176_p9), %s1240_s19, 10 }
  0x12   : > { %424 = vmatprep.subr.bf16.mxu0 (!%p176_p9), %v1188_v1  ;;  %956 = vmatprep.subr.bf16.mxu1 (!%p176_p9), %v1188_v1  ;;  %v1038_v12 = vld [vmem:[%s1536_s1 + $0x48] sm:$0xff] (!%p176_p9)   ;;  %v1039_v13 = vld [vmem:[%s1536_s1 + $0x50] ss:$0 sps:$4 sm:$0xff] (!%p176_p9)   ;;  %s824_s14 = sshll.u32 (!%p176_p9), %s1355_s13, 6  ;;  %s1393_s29 = scalar_lea.hbm (!%p176_p9), %s1537_s2, %s907_s22 }
  0x13   : > { %v420_v14 = vsel (!%p176_p9), %vm418_vm1, %v1039_v13, 0  ;;  %s648_s30 = scalar_lea.sflag (!%p176_p9), [#allocation3], %s1355_s13  ;;  %s1189_s6 = smov (!%p176_p9), [#allocation2]  }
  0x14   : > { %s1068_s7 = sshll.u32 (!%p176_p9), %s1189_s6, 4  ;;  %s1069_s7 = int_to_ptr.vmem [resolvable:$false] %s1068_s7 }
  0x15   : > { %425 = vmatpush1.bf16.msra.mxu0 (!%p176_p9), %v1030_v2  ;;  %967 = vmatpush1.bf16.msra.mxu1 (!%p176_p9), %v1030_v2 }
  0x16   : > { %426 = vmatprep.subr.bf16.mxu0 (!%p176_p9), %v1188_v1  ;;  %957 = vmatprep.subr.bf16.mxu1 (!%p176_p9), %v1188_v1 }
  0x17   : > { %s1547_s5 = smov (!%p213_p10, %s827_s5), 31 }
  0x18   : > { %s890_s8 = sshll.u32 %s1547_s5, 3 }
  0x19   : > { %s1288_s11 = scalar_lea.vmem %s1535_s0, %s890_s8  ;;  %427 = vmatpush1.bf16.msra.mxu0 %v1031_v3  ;;  %968 = vmatpush1.bf16.msra.mxu1 %v1031_v3  ;;  %s1070_s8 = scalar_lea.vmem %s1069_s7, 2048 }
  0x1a   : > { %428 = vmatprep.subr.bf16.mxu0 %v1188_v1  ;;  %958 = vmatprep.subr.bf16.mxu1 %v1188_v1  ;;  %v1042_v5 = vld [vmem:[%s1288_s11 + $0x4] ss:$8 sps:$4 sm:$0xff]   ;;  %v1040_v15 = vld [vmem:[%s1288_s11] ss:$8 sps:$4 sm:$0xff]   ;;  %v1043_v17 = vld [vmem:[%s1288_s11 + $0x14] ss:$8 sps:$4 sm:$0xff]  }
  0x1b   : > { %857 = vmatprep.mubr.msk.bf16.mxu0 %vm393_vm0, %v1042_v5  ;;  %v1048_v7 = vld [vmem:[%s1288_s11 + $0x44] ss:$8 sps:$4 sm:$0xff]   ;;  %v1046_v16 = vld [vmem:[%s1288_s11 + $0x40] ss:$8 sps:$4 sm:$0xff]   ;;  %v1052_v18 = vld [vmem:[%s1288_s11 + $0x54] ss:$8 sps:$4 sm:$0xff]  }
  0x1c   : > { %861 = vmatprep.mubr.msk.bf16.mxu1 %vm393_vm0, %v1048_v7  ;;  %v1045_v19 = vld [vmem:[%s1288_s11 + $0x10] ss:$8 sps:$4 sm:$0xff]   ;;  %v1049_v21 = vld [vmem:[%s1288_s11 + $0x24] ss:$8 sps:$4 sm:$0xff]   ;;  %v1051_v23 = vld [vmem:[%s1288_s11 + $0x20] ss:$8 sps:$4 sm:$0xff]  }
  0x1d   : > { %429 = vmatpush1.bf16.msra.mxu0 %v1032_v4  ;;  %969 = vmatpush1.bf16.msra.mxu1 %v1032_v4  ;;  %v1054_v20 = vld [vmem:[%s1288_s11 + $0x50] ss:$8 sps:$4 sm:$0xff]   ;;  %v1058_v22 = vld [vmem:[%s1288_s11 + $0x64] ss:$8 sps:$4 sm:$0xff]   ;;  %v1060_v24 = vld [vmem:[%s1288_s11 + $0x60] ss:$8 sps:$4 sm:$0xff]  }
  0x1e   : > { %430 = vmatprep.subr.bf16.mxu0 %v1188_v1  ;;  %959 = vmatprep.subr.bf16.mxu1 %v1188_v1  ;;  %v1055_v25 = vld [vmem:[%s1288_s11 + $0x34] ss:$8 sps:$4 sm:$0xff]   ;;  %v1057_v27 = vld [vmem:[%s1288_s11 + $0x30] ss:$8 sps:$4 sm:$0xff]  }
  0x1f   : > { %v1061_v26 = vld [vmem:[%s1288_s11 + $0x74] ss:$8 sps:$4 sm:$0xff]   ;;  %v1063_v28 = vld [vmem:[%s1288_s11 + $0x70] ss:$8 sps:$4 sm:$0xff]   ;;  %s1364_s11 = scalar_lea.vmem [#allocation2], %s824_s14 }
  0x20   : > { %s671_s23 = sshll.u32 %s1364_s11, 4  ;;  %s1395_s23 = int_to_ptr.vmem [resolvable:$true] %s671_s23 }
  0x21   : > { %431 = vmatpush1.bf16.msra.mxu0 %v1033_v6  ;;  %970 = vmatpush1.bf16.msra.mxu1 %v1033_v6  ;;  %s1064_s5 = scalar_lea.vmem %s1395_s23, 1024  ;;  %p1071_p0 = scmp.lt.s32.totalorder %s1395_s23, %s1069_s7 }
  0x22   : > { %432 = vmatprep.subr.bf16.mxu0 %v1188_v1  ;;  %960 = vmatprep.subr.bf16.mxu1 %v1188_v1  ;;  %p1065_p11 = scmp.ne.s32.totalorder %s1395_s23, %s1064_s5  ;;  %p1072_p1 = scmp.lt.s32.totalorder %s1070_s8, %s1064_s5 }
  0x24   : > { %p1066_p12 = pnand %p1065_p11, %p1259_p5  ;;  %p1073_p2 = por %p1072_p1, %p1071_p0 }
  0x25   : > { %433 = vmatpush1.bf16.msra.mxu0 %v1034_v8  ;;  %971 = vmatpush1.bf16.msra.mxu1 %v1034_v8 }
  0x26   : > { %434 = vmatprep.subr.bf16.mxu0 %v1188_v1  ;;  %961 = vmatprep.subr.bf16.mxu1 %v1188_v1  ;;  %p1067_p13 = pneg %p1066_p12 }
  0x28   : > { %p1074_p3 = pnand %p1073_p2, %p1067_p13 }
  0x29   : > { %435 = vmatpush1.bf16.msra.mxu0 %v1035_v9  ;;  %972 = vmatpush1.bf16.msra.mxu1 %v1035_v9 }
  0x2a   : > { %436 = vmatprep.subr.bf16.mxu0 %v1188_v1  ;;  %962 = vmatprep.subr.bf16.mxu1 %v1188_v1 }
  0x2d   : > { %437 = vmatpush1.bf16.msra.mxu0 %v1036_v10  ;;  %973 = vmatpush1.bf16.msra.mxu1 %v1036_v10 }
  0x2e   : > { %438 = vmatprep.subr.bf16.mxu0 %v1188_v1  ;;  %963 = vmatprep.subr.bf16.mxu1 %v1188_v1 }
  0x31   : > { %439 = vmatpush1.bf16.msra.mxu0 %v1037_v11  ;;  %974 = vmatpush1.bf16.msra.mxu1 %v1037_v11 }
  0x32   : > { %440 = vmatprep.subr.bf16.mxu0 %v1188_v1  ;;  %964 = vmatprep.subr.bf16.mxu1 %v1188_v1 }
  0x35   : > { %441 = vmatpush1.bf16.msra.mxu0 %v1038_v12  ;;  %975 = vmatpush1.bf16.msra.mxu1 %v1038_v12 }
  0x36   : > { %442 = vmatprep.subr.bf16.mxu0 %v1188_v1  ;;  %965 = vmatprep.subr.bf16.mxu1 %v1188_v1 }
  0x39   : > { %443 = vmatpush1.bf16.msra.mxu0 %v420_v14  ;;  %976 = vmatpush1.bf16.msra.mxu1 %v420_v14 }
  0x3c   : > { %455 = vmatmul.mubr.bf16.vlgmr.msra.gmra.mrb[0].mxu0 %v1040_v15  ;;  %487 = vmatmul.mubr.bf16.vlgmr.msra.gmra.mrb[0].mxu1 %v1046_v16 }
  0x3d   : > { %858 = vmatprep.mubr.msk.bf16.mxu0 %vm393_vm0, %v1043_v17  ;;  %862 = vmatprep.mubr.msk.bf16.mxu1 %vm393_vm0, %v1052_v18 }
  0x44   : > { %463 = vmatmul.mubr.bf16.gmra.mrb[4].mxu0 %v1045_v19  ;;  %495 = vmatmul.mubr.bf16.gmra.mrb[4].mxu1 %v1054_v20 }
  0x45   : > { %859 = vmatprep.mubr.msk.bf16.mxu0 %vm393_vm0, %v1049_v21  ;;  %863 = vmatprep.mubr.msk.bf16.mxu1 %vm393_vm0, %v1058_v22 }
  0x4c   : > { %471 = vmatmul.mubr.bf16.gmra.mrb[8].mxu0 %v1051_v23  ;;  %503 = vmatmul.mubr.bf16.gmra.mrb[8].mxu1 %v1060_v24 }
  0x4d   : > { %860 = vmatprep.mubr.msk.bf16.mxu0 %vm393_vm0, %v1055_v25  ;;  %864 = vmatprep.mubr.msk.bf16.mxu1 %vm393_vm0, %v1061_v26 }
  0x54   : > { %479 = vmatmul.mubr.bf16.gmra.mrb[12].mxu0 %v1057_v27  ;;  %511 = vmatmul.mubr.bf16.gmra.mrb[12].mxu1 %v1063_v28 }
 0x10f   : > { %v456_v29 = vpop.f32.mrb[0].mxu0  ;;  %v1358_v30 = vpop.f32.mrb[0].mxu1 }
 0x110   : > { %v458_v31 = vpop.f32.mrb[1].mxu0  ;;  %v490_v32 = vpop.f32.mrb[1].mxu1  ;;  %v615_v33 = vmul.f32 %v456_v29, %v456_v29  ;;  %v623_v26 = vmul.f32 %v1358_v30, %v1358_v30 }
 0x111   : > { %v459_v34 = vpop.f32.mrb[2].mxu0  ;;  %v1360_v35 = vpop.f32.mrb[2].mxu1 }
 0x112   : > { %v911_v36 = vpack.c.bf16 %v459_v34, %v456_v29  ;;  %v599_v37 = vadd.f32 %v459_v34, %v456_v29  ;;  %v616_v38 = vmul.f32 %v459_v34, %v459_v34  ;;  %v461_v39 = vpop.f32.mrb[3].mxu0  ;;  %v931_v40 = vpack.c.bf16 %v1360_v35, %v1358_v30  ;;  %v493_v41 = vpop.f32.mrb[3].mxu1 }
 0x113   : > { %v624_v29 = vmul.f32 %v1360_v35, %v1360_v35 }
 0x114   : > { %912 = vst [vmem:[%s1364_s11] sm:$0xff] %v911_v36   ;;  %v631_v42 = vadd.f32 %v616_v38, %v615_v33  ;;  %951 = vst [vmem:[%s1364_s11 + $0x20] sm:$0xff] %v931_v40  }
 0x117   : > { %v464_v43 = vpop.f32.mrb[4].mxu0  ;;  %v1368_v44 = vpop.f32.mrb[4].mxu1 }
 0x118   : > { %v600_v45 = vadd.f32 %v599_v37, %v464_v43  ;;  %v617_v46 = vmul.f32 %v464_v43, %v464_v43  ;;  %v466_v47 = vpop.f32.mrb[5].mxu0  ;;  %v498_v48 = vpop.f32.mrb[5].mxu1 }
 0x119   : > { %v467_v49 = vpop.f32.mrb[6].mxu0  ;;  %v1370_v50 = vpop.f32.mrb[6].mxu1 }
 0x11a   : > { %v632_v51 = vadd.f32 %v631_v42, %v617_v46  ;;  %v916_v52 = vpack.c.bf16 %v467_v49, %v464_v43  ;;  %v601_v53 = vadd.f32 %v600_v45, %v467_v49  ;;  %v618_v54 = vmul.f32 %v467_v49, %v467_v49  ;;  %v469_v55 = vpop.f32.mrb[7].mxu0  ;;  %v501_v56 = vpop.f32.mrb[7].mxu1 }
 0x11b   : > { %v936_v57 = vpack.c.bf16 %v1370_v50, %v1368_v44 }
 0x11c   : > { %948 = vst [vmem:[%s1364_s11 + $0x8] sm:$0xff] %v916_v52   ;;  %v633_v58 = vadd.f32 %v632_v51, %v618_v54 }
 0x11d   : > { %952 = vst [vmem:[%s1364_s11 + $0x28] sm:$0xff] %v936_v57  }
 0x11f   : > { %v472_v59 = vpop.f32.mrb[8].mxu0  ;;  %v1376_v60 = vpop.f32.mrb[8].mxu1 }
 0x120   : > { %v602_v61 = vadd.f32 %v601_v53, %v472_v59  ;;  %v619_v62 = vmul.f32 %v472_v59, %v472_v59  ;;  %v474_v63 = vpop.f32.mrb[9].mxu0  ;;  %v506_v0 = vpop.f32.mrb[9].mxu1 }
 0x121   : > { %v475_v1 = vpop.f32.mrb[10].mxu0  ;;  %v1378_v2 = vpop.f32.mrb[10].mxu1 }
 0x122   : > { %v634_v3 = vadd.f32 %v633_v58, %v619_v62  ;;  %v921_v4 = vpack.c.bf16 %v475_v1, %v472_v59  ;;  %v603_v5 = vadd.f32 %v602_v61, %v475_v1  ;;  %v620_v6 = vmul.f32 %v475_v1, %v475_v1  ;;  %v477_v7 = vpop.f32.mrb[11].mxu0  ;;  %v509_v8 = vpop.f32.mrb[11].mxu1 }
 0x123   : > { %v941_v9 = vpack.c.bf16 %v1378_v2, %v1376_v60 }
 0x124   : > { %949 = vst [vmem:[%s1364_s11 + $0x10] sm:$0xff] %v921_v4   ;;  %v635_v10 = vadd.f32 %v634_v3, %v620_v6 }
 0x125   : > { %953 = vst [vmem:[%s1364_s11 + $0x30] sm:$0xff] %v941_v9  }
 0x127   : > { %v480_v11 = vpop.f32.mrb[12].mxu0  ;;  %v1384_v12 = vpop.f32.mrb[12].mxu1 }
 0x128   : > { %v604_v13 = vadd.f32 %v603_v5, %v480_v11  ;;  %v621_v14 = vmul.f32 %v480_v11, %v480_v11  ;;  %v482_v15 = vpop.f32.mrb[13].mxu0  ;;  %v514_v16 = vpop.f32.mrb[13].mxu1 }
 0x129   : > { %v483_v17 = vpop.f32.mrb[14].mxu0  ;;  %v1388_v18 = vpop.f32.mrb[14].mxu1 }
 0x12a   : > { %v636_v19 = vadd.f32 %v635_v10, %v621_v14  ;;  %v926_v20 = vpack.c.bf16 %v483_v17, %v480_v11  ;;  %v605_v21 = vadd.f32 %v604_v13, %v483_v17  ;;  %v622_v22 = vmul.f32 %v483_v17, %v483_v17  ;;  %v485_v23 = vpop.f32.mrb[15].mxu0  ;;  %v517_v24 = vpop.f32.mrb[15].mxu1 }
 0x12b   : > { %v946_v25 = vpack.c.bf16 %v1388_v18, %v1384_v12 }
 0x12c   : > { %950 = vst [vmem:[%s1364_s11 + $0x18] sm:$0xff] %v926_v20   ;;  %v606_v27 = vadd.f32 %v605_v21, %v1358_v30  ;;  %v637_v28 = vadd.f32 %v636_v19, %v622_v22 }
 0x12d   : > { %954 = vst [vmem:[%s1364_s11 + $0x38] sm:$0xff] %v946_v25  }
 0x12e   : > { %v607_v31 = vadd.f32 %v606_v27, %v1360_v35  ;;  %v638_v32 = vadd.f32 %v637_v28, %v623_v26 }
 0x12f   : > { %1077 = shalt.err (!%p1074_p3)
}
 0x130   : > { %s1078_s9 = scalar_lea.hbm %s1393_s29, 1024  ;;  %s1082_s14 = scalar_lea.hbm %s1537_s2, 2048 }
 0x131   : > { %p1079_p4 = scmp.ne.s32.totalorder %s1393_s29, %s1078_s9  ;;  %p1083_p9 = scmp.lt.u32.totalorder %s1393_s29, %s1537_s2 }
 0x132   : > { %p1084_p10 = scmp.lt.u32.totalorder %s1082_s14, %s1078_s9  ;;  %p1086_p12 = scmp.lt.u32.totalorder %s1078_s9, %s1393_s29 }
 0x133   : > { %p1080_p7 = pnand %p1079_p4, %p1259_p5 }
 0x134   : > { %p1085_p11 = por %p1084_p10, %p1083_p9 }
 0x135   : > { %p1081_p8 = pneg %p1080_p7 }
 0x136   : > { %p1087_p13 = por %p1086_p12, %p1085_p11 }
 0x138   : > { %p1088_p0 = pnand %p1087_p13, %p1081_p8 }
 0x13a   : > { %1091 = shalt.err (!%p1088_p0)
}
 0x13b   : > { %s1190_s27 = smov 64   ;;  %s1191_s28 = smov 4   ;;  %v625_v30 = vmul.f32 %v1368_v44, %v1368_v44  ;;  %v639_v33 = vadd.f32 %v638_v32, %v624_v29  ;;  %v608_v34 = vadd.f32 %v607_v31, %v1368_v44  ;;  %v626_v35 = vmul.f32 %v1370_v50, %v1370_v50 }
 0x13c   : > { %977 = dma.vmem_to_hbm [thread:$0]  (%p1259_p5), %s1395_s23, 1024, %s1393_s29, %s648_s30, %s1190_s27, %s1190_s27, %s1191_s28   ;;  %v627_v39 = vmul.f32 %v1376_v60, %v1376_v60  ;;  %v628_v43 = vmul.f32 %v1378_v2, %v1378_v2  ;;  %v629_v44 = vmul.f32 %v1384_v12, %v1384_v12  ;;  %v630_v49 = vmul.f32 %v1388_v18, %v1388_v18 }
 0x13d   : > { %s825_s5 = sshll.u32 %s1355_s13, 3  ;;  %v609_v36 = vadd.f32 %v608_v34, %v1370_v50  ;;  %v640_v37 = vadd.f32 %v639_v33, %v625_v30  ;;  %s652_s13 = sand.u32 1, %s1240_s19  }
 0x13e   : > { %s886_s23 = sshll.u32 %s1240_s19, 7  ;;  %s204_s29 = scalar_lea.vmem [#allocation4], %s825_s5 }
 0x13f   : > { %v610_v38 = vadd.f32 %v609_v36, %v1376_v60  ;;  %v641_v40 = vadd.f32 %v640_v37, %v626_v35  ;;  %s687_s30 = sshll.u32 %s204_s29, 4  ;;  %s1449_s6 = scalar_lea.vmem [#allocation6], %s825_s5  ;;  %s1460_s30 = int_to_ptr.vmem [resolvable:$true] %s687_s30 }
 0x140   : > { %s700_s7 = sshll.u32 %s1449_s6, 4  ;;  %s1458_s19 = scalar_lea.hbm %s1538_s3, %s886_s23  ;;  %s1467_s7 = int_to_ptr.vmem [resolvable:$true] %s700_s7 }
 0x141   : > { %v642_v41 = vadd.f32 %v641_v40, %v627_v39  ;;  %v611_v42 = vadd.f32 %v610_v38, %v1378_v2  ;;  %s1465_s14 = scalar_lea.hbm %s1539_s4, %s886_s23  ;;  %s1469_s11 = scalar_lea.sflag [#allocation5], %s652_s13 }
 0x142   : > { %s1092_s22 = scalar_lea.vmem %s1460_s30, 128  ;;  %s1192_s27 = smov [#allocation4]  }
 0x143   : > { %v643_v45 = vadd.f32 %v642_v41, %v628_v43  ;;  %v612_v46 = vadd.f32 %v611_v42, %v1384_v12  ;;  %p1093_p1 = scmp.ne.s32.totalorder %s1460_s30, %s1092_s22  ;;  %s1096_s28 = sshll.u32 %s1192_s27, 4  ;;  %s1097_s28 = int_to_ptr.vmem [resolvable:$false] %s1096_s28 }
 0x144   : > { %s1098_s5 = scalar_lea.vmem %s1097_s28, 256  ;;  %p1099_p4 = scmp.lt.s32.totalorder %s1460_s30, %s1097_s28 }
 0x145   : > { %v644_v47 = vadd.f32 %v643_v45, %v629_v44  ;;  %v613_v48 = vadd.f32 %v612_v46, %v1388_v18  ;;  %p1094_p2 = pnand %p1093_p1, %p1259_p5  ;;  %p1100_p7 = scmp.lt.s32.totalorder %s1098_s5, %s1092_s22 }
 0x147   : > { %v645_v50 = vadd.f32 %v644_v47, %v630_v49  ;;  %614 = vst [vmem:[%s204_s29] sm:$0xff] %v613_v48  ;;  %p1095_p3 = pneg %p1094_p2  ;;  %p1101_p8 = por %p1100_p7, %p1099_p4 }
 0x149   : > { %p1102_p9 = pnand %p1101_p8, %p1095_p3 }
 0x14b   : > { %1105 = shalt.err (!%p1102_p9)
}
 0x14c   : > { %s1106_s13 = scalar_lea.hbm %s1458_s19, 128  ;;  %s1110_s8 = scalar_lea.hbm %s1538_s3, 256 }
 0x14d   : > { %p1107_p10 = scmp.ne.s32.totalorder %s1458_s19, %s1106_s13  ;;  %p1111_p13 = scmp.lt.u32.totalorder %s1458_s19, %s1538_s3 }
 0x14e   : > { %p1112_p0 = scmp.lt.u32.totalorder %s1110_s8, %s1106_s13  ;;  %p1114_p2 = scmp.lt.u32.totalorder %s1106_s13, %s1458_s19 }
 0x14f   : > { %p1108_p11 = pnand %p1107_p10, %p1259_p5 }
 0x150   : > { %p1113_p1 = por %p1112_p0, %p1111_p13 }
 0x151   : > { %p1109_p12 = pneg %p1108_p11 }
 0x152   : > { %p1115_p3 = por %p1114_p2, %p1113_p1 }
 0x154   : > { %p1116_p4 = pnand %p1115_p3, %p1109_p12 }
 0x156   : > { %1119 = shalt.err (!%p1116_p4)
}
 0x157   : > { %978 = dma.vmem_to_hbm [thread:$0]  (%p1259_p5), %s1460_s30, 128, %s1458_s19, %s1469_s11   ;;  %646 = vst [vmem:[%s1449_s6] sm:$0xff] %v645_v50 }
 0x158   : > { %s1120_s12 = scalar_lea.vmem %s1467_s7, 128  ;;  %s1193_s22 = smov [#allocation6]  }
 0x159   : > { %p1121_p7 = scmp.ne.s32.totalorder %s1467_s7, %s1120_s12  ;;  %s1124_s27 = sshll.u32 %s1193_s22, 4  ;;  %s1125_s27 = int_to_ptr.vmem [resolvable:$false] %s1124_s27 }
 0x15a   : > { %s1126_s28 = scalar_lea.vmem %s1125_s27, 256  ;;  %p1127_p10 = scmp.lt.s32.totalorder %s1467_s7, %s1125_s27 }
 0x15b   : > { %p1122_p8 = pnand %p1121_p7, %p1259_p5  ;;  %p1128_p11 = scmp.lt.s32.totalorder %s1126_s28, %s1120_s12 }
 0x15d   : > { %p1123_p9 = pneg %p1122_p8  ;;  %p1129_p12 = por %p1128_p11, %p1127_p10 }
 0x15f   : > { %p1130_p13 = pnand %p1129_p12, %p1123_p9 }
 0x161   : > { %1133 = shalt.err (!%p1130_p13)
}
 0x162   : > { %s1134_s30 = scalar_lea.hbm %s1465_s14, 128  ;;  %s1138_s5 = scalar_lea.hbm %s1539_s4, 256 }
 0x163   : > { %p1135_p0 = scmp.ne.s32.totalorder %s1465_s14, %s1134_s30  ;;  %p1139_p3 = scmp.lt.u32.totalorder %s1465_s14, %s1539_s4 }
 0x164   : > { %p1140_p4 = scmp.lt.u32.totalorder %s1138_s5, %s1134_s30  ;;  %p1142_p8 = scmp.lt.u32.totalorder %s1134_s30, %s1465_s14 }
 0x165   : > { %p1136_p1 = pnand %p1135_p0, %p1259_p5 }
 0x166   : > { %p1141_p7 = por %p1140_p4, %p1139_p3 }
 0x167   : > { %p1137_p2 = pneg %p1136_p1 }
 0x168   : > { %p1143_p9 = por %p1142_p8, %p1141_p7 }
 0x16a   : > { %p1144_p10 = pnand %p1143_p9, %p1137_p2 }
 0x16c   : > { %1147 = shalt.err (!%p1144_p10)
}
 0x16d   : > { %979 = dma.vmem_to_hbm [thread:$0]  (%p1259_p5), %s1467_s7, 128, %s1465_s14, %s1469_s11  }
 0x16e PF: > { %p993_p11 = scmp.ge.s32.totalorder %s1186_s18, 2  ;;  %s712_s29 = sand.u32 1, %s1174_s15  }
 0x16f   : > { %s713_s8 = scalar_lea.sflag [#allocation3], %s712_s29 }
 0x170   : > { %p984_p12 = pnand %p993_p11, %p1263_p6 }
 0x172   : > { %1165 = dma.done.wait (!%p984_p12), %s713_s8, 1024  }
 0x173   : > { %1167 = vsyncadd (!%p984_p12), %s713_s8, 4294966272  ;;  %s721_s9 = sand.u32 1, %s820_s20  }
 0x174   : > { %s722_s10 = scalar_lea.sflag [#allocation5], %s721_s9 }
 0x175   : > { %1169 = dma.done.wait (!%p984_p12), %s722_s10, 256  }
 0x176   : > { %1171 = vsyncadd (!%p984_p12), %s722_s10, 4294967040  ;;  %p18_p5 = scmp.ge.s32.totalorder %s1244_s21, 4   ;;  %s1542_s15 = smov %s1178_s16 }
 0x177   : > { %s1543_s16 = smov %s1182_s17  ;;  %s1544_s17 = smov %s1257_s24 }
 0x178   : > { %s1545_s18 = smov %s1244_s21  ;;  %20 = sbr.rel (!%p18_p5) target bundleno = 5 (0x5), region = 95 }
 0x17f   :  { %736 = vsyncpa [#allocation3], 1 }
 0x180   :  { %738 = vsyncpa [#allocation3 + $0x1], 1 }
 0x181   :  { %739 = vsyncpa [#allocation5], 1 }
 0x182   :  { %741 = vsyncpa [#allocation5 + $0x1], 1 }

</bundles_post_ra>
